<compile_context>
chip_gen: v7x
topology: tpu7x:2x2x1
jax: 0.10.0
libtpu: 0.0.40
codegen_flags: <defaults>
</compile_context>

<pallas_src>
import functools
import math
import sys

import jax
import jax.numpy as jnp
from jax.experimental import pallas as pl
from jax.experimental.pallas import tpu as pltpu


def _layer_norm(x, gamma, beta, eps=1e-5):
    # x: (N, C) f32; gamma/beta: (1, C) f32
    mean = jnp.mean(x, axis=-1, keepdims=True)
    var = jnp.mean((x - mean) ** 2, axis=-1, keepdims=True)
    inv = jax.lax.rsqrt(var + eps)
    return (x - mean) * inv * gamma + beta


def _gelu_exact(x):
    # matches torch.nn.GELU() (erf-based, non-approximate)
    return 0.5 * x * (1.0 + jax.lax.erf(x * (1.0 / math.sqrt(2.0))))


def block_kernel(x_ref,
                 ln1_g_ref, ln1_b_ref,
                 w_qkv_ref,
                 w_proj_ref, b_proj_ref,
                 ln2_g_ref, ln2_b_ref,
                 w_fc1_ref, b_fc1_ref,
                 w_fc2_ref, b_fc2_ref,
                 o_ref,
                 *, num_heads, compute_dtype, approx_recip):
    f32 = jnp.float32
    x = x_ref[0].astype(f32)                          # (N, C)
    N, C = x.shape
    H = num_heads
    hd = C // H

    # ---- Attention branch --------------------------------------------------
    xn = _layer_norm(x, ln1_g_ref[...].astype(f32), ln1_b_ref[...].astype(f32))

    # One fused MXU matmul for q,k,v of all heads (bf16 operands, f32 acc).
    qkv = jnp.dot(xn.astype(compute_dtype), w_qkv_ref[...],
                  preferred_element_type=f32)          # (N, 3C) f32

    # Cast ONCE to the compute dtype, then split heads onto a leading axis so
    # QK^T and PV each run as a single head-batched dot_general (leading batch
    # dim == the supported MXU form).  Slices are bf16, so the per-head copies
    # cost half the bytes and carry no per-slice cast.
    qkvc = qkv.astype(compute_dtype)                   # (N, 3C) bf16

    def heads(base):
        return jnp.stack(
            [qkvc[:, base + h * hd: base + (h + 1) * hd] for h in range(H)],
            axis=0)                                    # (H, N, hd)

    q = heads(0)            # attention scale is baked into w_qkv's q columns
    k = heads(C)
    v = heads(2 * C)

    # Scores + numerically-stable softmax numerator in f32.
    s = jnp.einsum("hnd,hmd->hnm", q, k,
                   preferred_element_type=f32)         # (H, N, N) f32
    s = s - jnp.max(s, axis=-1, keepdims=True)
    p = jnp.exp(s)                                     # un-normalized probs
    denom = jnp.sum(p, axis=-1, keepdims=True)         # (H, N, 1) f32

    # PV matmul on UN-normalized bf16 probabilities; normalize the much
    # smaller (H, N, hd) context afterwards (N/hd fewer multiplies, EUP slot).
    ctx = jnp.einsum("hnm,hmd->hnd", p.astype(compute_dtype), v,
                     preferred_element_type=f32)       # (H, N, hd) f32
    ctx = ctx * pl.reciprocal(denom, approx=approx_recip)

    # Merge heads back to (N, C) in bf16 (half the relayout traffic) and run
    # the output projection as one full-width (K = C) MXU matmul.
    ctx_b = ctx.astype(compute_dtype)
    ctx_cat = jnp.concatenate([ctx_b[h] for h in range(H)], axis=-1)   # (N, C)
    attn_out = jnp.dot(ctx_cat, w_proj_ref[...],
                       preferred_element_type=f32) + b_proj_ref[...].astype(f32)

    x1 = x + attn_out                                  # residual in f32

    # ---- MLP branch ----------------------------------------------------------
    xn2 = _layer_norm(x1, ln2_g_ref[...].astype(f32), ln2_b_ref[...].astype(f32))
    h1 = jnp.dot(xn2.astype(compute_dtype), w_fc1_ref[...],
                 preferred_element_type=f32) + b_fc1_ref[...].astype(f32)
    h1 = _gelu_exact(h1)                               # exact (erf) GELU in f32
    h2 = jnp.dot(h1.astype(compute_dtype), w_fc2_ref[...],
                 preferred_element_type=f32) + b_fc2_ref[...].astype(f32)

    o_ref[0] = (x1 + h2).astype(o_ref.dtype)


def _build_block_call(B, N, C, Hmlp, num_heads, x_dtype, compute_dtype,
                      approx_recip, weight_pipeline_mode, vmem_limit_bytes,
                      cost_estimate):
    kern = functools.partial(block_kernel, num_heads=num_heads,
                             compute_dtype=compute_dtype,
                             approx_recip=approx_recip)

    def wspec(shape):
        kwargs = {}
        if weight_pipeline_mode is not None:
            kwargs["pipeline_mode"] = weight_pipeline_mode
        return pl.BlockSpec(shape, lambda b: (0, 0), **kwargs)

    grid_spec = pltpu.PrefetchScalarGridSpec(
        num_scalar_prefetch=0,
        grid=(B,),
        in_specs=[
            pl.BlockSpec((1, N, C), lambda b: (b, 0, 0)),   # x
            wspec((1, C)), wspec((1, C)),                   # ln1 gamma / beta
            wspec((C, 3 * C)),                              # w_qkv (scale baked)
            wspec((C, C)), wspec((1, C)),                   # w_proj, b_proj
            wspec((1, C)), wspec((1, C)),                   # ln2 gamma / beta
            wspec((C, Hmlp)), wspec((1, Hmlp)),             # fc1
            wspec((Hmlp, C)), wspec((1, C)),                # fc2
        ],
        out_specs=pl.BlockSpec((1, N, C), lambda b: (b, 0, 0)),
    )

    return pl.pallas_call(
        kern,
        out_shape=jax.ShapeDtypeStruct((B, N, C), x_dtype),
        grid_spec=grid_spec,
        compiler_params=pltpu.CompilerParams(
            dimension_semantics=("parallel",),
            vmem_limit_bytes=vmem_limit_bytes),
        cost_estimate=cost_estimate,
    )


def _vmem_capacity_bytes():
    """Per-TensorCore VMEM capacity; conservative (v7x) default if unknown."""
    try:
        info = pltpu.get_tpu_info()
        cap = getattr(info, "vmem_capacity_bytes", None)
        if cap:
            return int(cap)
    except Exception:
        pass
    return 64 << 20


# Error types that plausibly mean "pipeline_mode=Buffered(1) rejected" rather
# than a genuine, unrelated compile bug.
_PIPELINE_MODE_FALLBACK_ERRORS = (TypeError, ValueError, NotImplementedError,
                                  pltpu.LoweringException)


def transformer_block(x, params, *, num_heads, compute_dtype=jnp.bfloat16,
                      approx_softmax_recip=True):
    B, N, C = x.shape
    hd = C // num_heads
    scale = hd ** (-0.5)
    Hmlp = params["w_fc1"].shape[1]
    f32 = jnp.float32

    # Bake the attention scale into the q columns of the fused qkv weight.
    w_qkv = params["w_qkv"].astype(f32).at[:, :C].multiply(scale)

    weights = (
        params["ln1_g"].astype(f32), params["ln1_b"].astype(f32),
        w_qkv.astype(compute_dtype),
        params["w_proj"].astype(compute_dtype), params["b_proj"].astype(f32),
        params["ln2_g"].astype(f32), params["ln2_b"].astype(f32),
        params["w_fc1"].astype(compute_dtype), params["b_fc1"].astype(f32),
        params["w_fc2"].astype(compute_dtype), params["b_fc2"].astype(f32),
    )

    # ---- VMEM budget (hint only), capped by the actual chip capacity --------
    itemsize = jnp.dtype(x.dtype).itemsize
    weight_bytes = sum(int(w.size) * jnp.dtype(w.dtype).itemsize for w in weights)
    H = num_heads
    act_bytes = (4 * (10 * N * C + 2 * H * N * N + 2 * N * Hmlp)     # f32 temps
                 + 2 * (10 * N * C + H * N * N + N * Hmlp))          # bf16 temps
    io_bytes = 2 * 2 * N * C * itemsize                              # dbl-buffered x/o
    vmem_needed = 2 * weight_bytes + act_bytes + io_bytes + (8 << 20)
    vmem_cap = _vmem_capacity_bytes()
    vmem_limit = int(min(max(vmem_needed, 32 << 20), int(0.85 * vmem_cap)))

    flops = B * (8 * N * C * C + 4 * N * N * C + 4 * N * C * Hmlp)
    transc = B * (H * N * N + N * Hmlp + H * N + 2 * N)
    bytes_accessed = 2 * B * N * C * itemsize + weight_bytes
    cost = pl.CostEstimate(flops=int(flops), transcendentals=int(transc),
                           bytes_accessed=int(bytes_accessed))

    build = functools.partial(_build_block_call, B, N, C, Hmlp, num_heads,
                              x.dtype, compute_dtype, approx_softmax_recip)

    # Weight blocks never change across grid steps -> request single buffering
    # to halve their resident VMEM.  Fall back (loudly, and only on the narrow
    # "pipeline_mode rejected" error set) to default double buffering.
    buffered = getattr(pl, "Buffered", None)
    if buffered is not None:
        try:
            fn = build(buffered(1), vmem_limit, cost)
            return fn(x, *weights)
        except _PIPELINE_MODE_FALLBACK_ERRORS as err:
            print(f"[transformer_block] single-buffered weight specs rejected "
                  f"({type(err).__name__}: {err}); falling back to default "
                  f"double-buffered weights.", file=sys.stderr)

    fn = build(None, vmem_limit, cost)
    return fn(x, *weights)


def reference_block(x, params, *, num_heads):
    # Plain-JAX (f32) reference mirroring the PyTorch forward pass.
    B, N, C = x.shape
    hd = C // num_heads
    scale = hd ** (-0.5)

    def ln(v, g, b, eps=1e-5):
        m = jnp.mean(v, axis=-1, keepdims=True)
        s = jnp.mean((v - m) ** 2, axis=-1, keepdims=True)
        return (v - m) / jnp.sqrt(s + eps) * g + b

    xn = ln(x, params["ln1_g"], params["ln1_b"])
    qkv = xn @ params["w_qkv"]                                  # (B, N, 3C)
    qkv = qkv.reshape(B, N, 3, num_heads, hd).transpose(2, 0, 3, 1, 4)
    q, k, v = qkv[0], qkv[1], qkv[2]                            # (B, H, N, hd)
    attn = jnp.einsum("bhnd,bhmd->bhnm", q, k) * scale
    attn = jax.nn.softmax(attn, axis=-1)
    out = jnp.einsum("bhnm,bhmd->bhnd", attn, v)
    out = out.transpose(0, 2, 1, 3).reshape(B, N, C)
    out = out @ params["w_proj"] + params["b_proj"]
    x1 = x + out

    xn2 = ln(x1, params["ln2_g"], params["ln2_b"])
    h = jax.nn.gelu(xn2 @ params["w_fc1"] + params["b_fc1"], approximate=False)
    h = h @ params["w_fc2"] + params["b_fc2"]
    return x1 + h


if __name__ == "__main__":
    B, N, C = 2, 8, 32
    num_heads = 4
    mlp_ratio = 4.0
    Hmlp = int(C * mlp_ratio)

    key = jax.random.PRNGKey(0)
    ks = jax.random.split(key, 8)

    params = {
        "ln1_g": jnp.ones((1, C), jnp.float32),
        "ln1_b": jnp.zeros((1, C), jnp.float32),
        # weights stored as (in, out) == torch weight.T
        "w_qkv": jax.random.normal(ks[0], (C, 3 * C), jnp.float32) * 0.05,
        "w_proj": jax.random.normal(ks[1], (C, C), jnp.float32) * 0.05,
        "b_proj": jax.random.normal(ks[2], (1, C), jnp.float32) * 0.02,
        "ln2_g": jnp.ones((1, C), jnp.float32),
        "ln2_b": jnp.zeros((1, C), jnp.float32),
        "w_fc1": jax.random.normal(ks[3], (C, Hmlp), jnp.float32) * 0.05,
        "b_fc1": jax.random.normal(ks[4], (1, Hmlp), jnp.float32) * 0.02,
        "w_fc2": jax.random.normal(ks[5], (Hmlp, C), jnp.float32) * 0.05,
        "b_fc2": jnp.array(jax.random.normal(ks[6], (1, C), jnp.float32) * 0.02),
    }

    x = jax.random.normal(ks[7], (B, N, C), jnp.float32)

    out = transformer_block(x, params, num_heads=num_heads)
    out = jax.block_until_ready(out)

    ref = reference_block(x, params, num_heads=num_heads)
    assert out.shape == (B, N, C)
    # Kernel runs its matmuls in bf16 (f32 accumulation); compare against the
    # f32 reference at a bf16-appropriate tolerance.
    assert jnp.allclose(out, ref, atol=2e-2, rtol=2e-2), "mismatch vs reference"

    print("KERNEL_OK")
</pallas_src>

<mosaic_0001>
module attributes {stable_mosaic.version = 11 : i64} {
  func.func @block_kernel(%arg0: i32, %arg1: memref<1x8x32xf32, #tpu.memory_space<vmem>>, %arg2: memref<1x32xf32, #tpu.memory_space<vmem>>, %arg3: memref<1x32xf32, #tpu.memory_space<vmem>>, %arg4: memref<32x96xbf16, #tpu.memory_space<vmem>>, %arg5: memref<32x32xbf16, #tpu.memory_space<vmem>>, %arg6: memref<1x32xf32, #tpu.memory_space<vmem>>, %arg7: memref<1x32xf32, #tpu.memory_space<vmem>>, %arg8: memref<1x32xf32, #tpu.memory_space<vmem>>, %arg9: memref<32x128xbf16, #tpu.memory_space<vmem>>, %arg10: memref<1x128xf32, #tpu.memory_space<vmem>>, %arg11: memref<128x32xbf16, #tpu.memory_space<vmem>>, %arg12: memref<1x32xf32, #tpu.memory_space<vmem>>, %arg13: memref<1x8x32xf32, #tpu.memory_space<vmem>>) attributes {dimension_semantics = [#tpu.dimension_semantics<parallel>], iteration_bounds = array<i64: 2>, scalar_prefetch = 0 : i64, scratch_operands = 0 : i64, tpu.core_type = #tpu.core_type<tc>, window_params = [{transform_indices = @transform_0, window_bounds = array<i64: 1, 8, 32>}, {pipeline_mode = #tpu.pipeline_mode<synchronous>, transform_indices = @transform_1, window_bounds = array<i64: 1, 32>}, {pipeline_mode = #tpu.pipeline_mode<synchronous>, transform_indices = @transform_2, window_bounds = array<i64: 1, 32>}, {pipeline_mode = #tpu.pipeline_mode<synchronous>, transform_indices = @transform_3, window_bounds = array<i64: 32, 96>}, {pipeline_mode = #tpu.pipeline_mode<synchronous>, transform_indices = @transform_4, window_bounds = array<i64: 32, 32>}, {pipeline_mode = #tpu.pipeline_mode<synchronous>, transform_indices = @transform_5, window_bounds = array<i64: 1, 32>}, {pipeline_mode = #tpu.pipeline_mode<synchronous>, transform_indices = @transform_6, window_bounds = array<i64: 1, 32>}, {pipeline_mode = #tpu.pipeline_mode<synchronous>, transform_indices = @transform_7, window_bounds = array<i64: 1, 32>}, {pipeline_mode = #tpu.pipeline_mode<synchronous>, transform_indices = @transform_8, window_bounds = array<i64: 32, 128>}, {pipeline_mode = #tpu.pipeline_mode<synchronous>, transform_indices = @transform_9, window_bounds = array<i64: 1, 128>}, {pipeline_mode = #tpu.pipeline_mode<synchronous>, transform_indices = @transform_10, window_bounds = array<i64: 128, 32>}, {pipeline_mode = #tpu.pipeline_mode<synchronous>, transform_indices = @transform_11, window_bounds = array<i64: 1, 32>}, {transform_indices = @transform_12, window_bounds = array<i64: 1, 8, 32>}]} {
    %c0 = arith.constant 0 : index
    %c0_0 = arith.constant 0 : index
    %c0_1 = arith.constant 0 : index
    %0 = vector.load %arg1[%c0, %c0_0, %c0_1] : memref<1x8x32xf32, #tpu.memory_space<vmem>>, vector<1x8x32xf32>
    %1 = vector.shape_cast %0 : vector<1x8x32xf32> to vector<8x32xf32>
    %c0_2 = arith.constant 0 : index
    %c0_3 = arith.constant 0 : index
    %2 = vector.load %arg2[%c0_2, %c0_3] : memref<1x32xf32, #tpu.memory_space<vmem>>, vector<1x32xf32>
    %c0_4 = arith.constant 0 : index
    %c0_5 = arith.constant 0 : index
    %3 = vector.load %arg3[%c0_4, %c0_5] : memref<1x32xf32, #tpu.memory_space<vmem>>, vector<1x32xf32>
    %cst = arith.constant dense<0.000000e+00> : vector<8xf32>
    %4 = vector.multi_reduction <add>, %1, %cst [1] : vector<8x32xf32> to vector<8xf32>
    %5 = vector.shape_cast %4 : vector<8xf32> to vector<8x1xf32>
    %cst_6 = arith.constant 3.200000e+01 : f32
    %6 = vector.broadcast %cst_6 : f32 to vector<8x1xf32>
    %7 = arith.divf %5, %6 : vector<8x1xf32>
    %8 = vector.broadcast %7 : vector<8x1xf32> to vector<8x32xf32>
    %9 = arith.subf %1, %8 : vector<8x32xf32>
    %10 = arith.mulf %9, %9 : vector<8x32xf32>
    %cst_7 = arith.constant dense<0.000000e+00> : vector<8xf32>
    %11 = vector.multi_reduction <add>, %10, %cst_7 [1] : vector<8x32xf32> to vector<8xf32>
    %12 = vector.shape_cast %11 : vector<8xf32> to vector<8x1xf32>
    %cst_8 = arith.constant 3.200000e+01 : f32
    %13 = vector.broadcast %cst_8 : f32 to vector<8x1xf32>
    %14 = arith.divf %12, %13 : vector<8x1xf32>
    %cst_9 = arith.constant 9.99999974E-6 : f32
    %15 = vector.broadcast %cst_9 : f32 to vector<8x1xf32>
    %16 = arith.addf %14, %15 : vector<8x1xf32>
    %17 = math.rsqrt %16 : vector<8x1xf32>
    %18 = vector.broadcast %7 : vector<8x1xf32> to vector<8x32xf32>
    %19 = arith.subf %1, %18 : vector<8x32xf32>
    %20 = vector.broadcast %17 : vector<8x1xf32> to vector<8x32xf32>
    %21 = arith.mulf %19, %20 : vector<8x32xf32>
    %22 = vector.broadcast %2 : vector<1x32xf32> to vector<8x32xf32>
    %23 = arith.mulf %21, %22 : vector<8x32xf32>
    %24 = vector.broadcast %3 : vector<1x32xf32> to vector<8x32xf32>
    %25 = arith.addf %23, %24 : vector<8x32xf32>
    %26 = arith.truncf %25 : vector<8x32xf32> to vector<8x32xbf16>
    %c0_10 = arith.constant 0 : index
    %c0_11 = arith.constant 0 : index
    %27 = vector.load %arg4[%c0_10, %c0_11] : memref<32x96xbf16, #tpu.memory_space<vmem>>, vector<32x96xbf16>
    %cst_12 = arith.constant dense<0.000000e+00> : vector<8x96xf32>
    %28 = tpu.matmul %26, %27, %cst_12 {dimension_numbers = #tpu.dot_dimension_numbers<[1], [0], [0], [1], [0, 0, 1, 1], [], []>} : vector<8x32xbf16>, vector<32x96xbf16>, vector<8x96xf32> -> vector<8x96xf32>
    %29 = arith.truncf %28 : vector<8x96xf32> to vector<8x96xbf16>
    %30 = vector.extract_strided_slice %29 {offsets = [0, 0], sizes = [8, 8], strides = [1, 1]} : vector<8x96xbf16> to vector<8x8xbf16>
    %31 = vector.extract_strided_slice %29 {offsets = [0, 8], sizes = [8, 8], strides = [1, 1]} : vector<8x96xbf16> to vector<8x8xbf16>
    %32 = vector.extract_strided_slice %29 {offsets = [0, 16], sizes = [8, 8], strides = [1, 1]} : vector<8x96xbf16> to vector<8x8xbf16>
    %33 = vector.extract_strided_slice %29 {offsets = [0, 24], sizes = [8, 8], strides = [1, 1]} : vector<8x96xbf16> to vector<8x8xbf16>
    %34 = vector.shape_cast %30 : vector<8x8xbf16> to vector<1x8x8xbf16>
    %35 = vector.shape_cast %31 : vector<8x8xbf16> to vector<1x8x8xbf16>
    %36 = vector.shape_cast %32 : vector<8x8xbf16> to vector<1x8x8xbf16>
    %37 = vector.shape_cast %33 : vector<8x8xbf16> to vector<1x8x8xbf16>
    %38 = tpu.concatenate %34, %35, %36, %37 in 0 : vector<1x8x8xbf16>, vector<1x8x8xbf16>, vector<1x8x8xbf16>, vector<1x8x8xbf16> -> vector<4x8x8xbf16>
    %39 = vector.extract_strided_slice %29 {offsets = [0, 32], sizes = [8, 8], strides = [1, 1]} : vector<8x96xbf16> to vector<8x8xbf16>
    %40 = vector.extract_strided_slice %29 {offsets = [0, 40], sizes = [8, 8], strides = [1, 1]} : vector<8x96xbf16> to vector<8x8xbf16>
    %41 = vector.extract_strided_slice %29 {offsets = [0, 48], sizes = [8, 8], strides = [1, 1]} : vector<8x96xbf16> to vector<8x8xbf16>
    %42 = vector.extract_strided_slice %29 {offsets = [0, 56], sizes = [8, 8], strides = [1, 1]} : vector<8x96xbf16> to vector<8x8xbf16>
    %43 = vector.shape_cast %39 : vector<8x8xbf16> to vector<1x8x8xbf16>
    %44 = vector.shape_cast %40 : vector<8x8xbf16> to vector<1x8x8xbf16>
    %45 = vector.shape_cast %41 : vector<8x8xbf16> to vector<1x8x8xbf16>
    %46 = vector.shape_cast %42 : vector<8x8xbf16> to vector<1x8x8xbf16>
    %47 = tpu.concatenate %43, %44, %45, %46 in 0 : vector<1x8x8xbf16>, vector<1x8x8xbf16>, vector<1x8x8xbf16>, vector<1x8x8xbf16> -> vector<4x8x8xbf16>
    %48 = vector.extract_strided_slice %29 {offsets = [0, 64], sizes = [8, 8], strides = [1, 1]} : vector<8x96xbf16> to vector<8x8xbf16>
    %49 = vector.extract_strided_slice %29 {offsets = [0, 72], sizes = [8, 8], strides = [1, 1]} : vector<8x96xbf16> to vector<8x8xbf16>
    %50 = vector.extract_strided_slice %29 {offsets = [0, 80], sizes = [8, 8], strides = [1, 1]} : vector<8x96xbf16> to vector<8x8xbf16>
    %51 = vector.extract_strided_slice %29 {offsets = [0, 88], sizes = [8, 8], strides = [1, 1]} : vector<8x96xbf16> to vector<8x8xbf16>
    %52 = vector.shape_cast %48 : vector<8x8xbf16> to vector<1x8x8xbf16>
    %53 = vector.shape_cast %49 : vector<8x8xbf16> to vector<1x8x8xbf16>
    %54 = vector.shape_cast %50 : vector<8x8xbf16> to vector<1x8x8xbf16>
    %55 = vector.shape_cast %51 : vector<8x8xbf16> to vector<1x8x8xbf16>
    %56 = tpu.concatenate %52, %53, %54, %55 in 0 : vector<1x8x8xbf16>, vector<1x8x8xbf16>, vector<1x8x8xbf16>, vector<1x8x8xbf16> -> vector<4x8x8xbf16>
    "tpu.trace_start"() <{level = 10 : i32, message = "hnd,hmd->hnm"}> : () -> ()
    %cst_13 = arith.constant dense<0.000000e+00> : vector<4x8x8xf32>
    %57 = tpu.matmul %38, %47, %cst_13 {dimension_numbers = #tpu.dot_dimension_numbers<[2], [2], [1], [1], [0, 0, 0, 1, 1, 1], [0], [0]>} : vector<4x8x8xbf16>, vector<4x8x8xbf16>, vector<4x8x8xf32> -> vector<4x8x8xf32>
    "tpu.trace_stop"() : () -> ()
    %cst_14 = arith.constant dense<0xFF800000> : vector<4x8xf32>
    %58 = vector.multi_reduction <maximumf>, %57, %cst_14 [2] : vector<4x8x8xf32> to vector<4x8xf32>
    %59 = vector.shape_cast %58 : vector<4x8xf32> to vector<4x8x1xf32>
    %60 = vector.broadcast %59 : vector<4x8x1xf32> to vector<4x8x8xf32>
    %61 = arith.subf %57, %60 : vector<4x8x8xf32>
    %62 = math.exp %61 : vector<4x8x8xf32>
    %cst_15 = arith.constant dense<0.000000e+00> : vector<4x8xf32>
    %63 = vector.multi_reduction <add>, %62, %cst_15 [2] : vector<4x8x8xf32> to vector<4x8xf32>
    %64 = vector.shape_cast %63 : vector<4x8xf32> to vector<4x8x1xf32>
    %65 = arith.truncf %62 : vector<4x8x8xf32> to vector<4x8x8xbf16>
    "tpu.trace_start"() <{level = 10 : i32, message = "hnm,hmd->hnd"}> : () -> ()
    %cst_16 = arith.constant dense<0.000000e+00> : vector<4x8x8xf32>
    %66 = tpu.matmul %65, %56, %cst_16 {dimension_numbers = #tpu.dot_dimension_numbers<[2], [1], [1], [2], [0, 0, 0, 1, 1, 2], [0], [0]>} : vector<4x8x8xbf16>, vector<4x8x8xbf16>, vector<4x8x8xf32> -> vector<4x8x8xf32>
    "tpu.trace_stop"() : () -> ()
    %67 = tpu.reciprocal %64 {approx = true} : vector<4x8x1xf32> -> vector<4x8x1xf32>
    %68 = vector.broadcast %67 : vector<4x8x1xf32> to vector<4x8x8xf32>
    %69 = arith.mulf %66, %68 : vector<4x8x8xf32>
    %70 = arith.truncf %69 : vector<4x8x8xf32> to vector<4x8x8xbf16>
    %71 = vector.extract_strided_slice %70 {offsets = [0, 0, 0], sizes = [1, 8, 8], strides = [1, 1, 1]} : vector<4x8x8xbf16> to vector<1x8x8xbf16>
    %72 = vector.shape_cast %71 : vector<1x8x8xbf16> to vector<8x8xbf16>
    %73 = vector.extract_strided_slice %70 {offsets = [1, 0, 0], sizes = [1, 8, 8], strides = [1, 1, 1]} : vector<4x8x8xbf16> to vector<1x8x8xbf16>
    %74 = vector.shape_cast %73 : vector<1x8x8xbf16> to vector<8x8xbf16>
    %75 = vector.extract_strided_slice %70 {offsets = [2, 0, 0], sizes = [1, 8, 8], strides = [1, 1, 1]} : vector<4x8x8xbf16> to vector<1x8x8xbf16>
    %76 = vector.shape_cast %75 : vector<1x8x8xbf16> to vector<8x8xbf16>
    %77 = vector.extract_strided_slice %70 {offsets = [3, 0, 0], sizes = [1, 8, 8], strides = [1, 1, 1]} : vector<4x8x8xbf16> to vector<1x8x8xbf16>
    %78 = vector.shape_cast %77 : vector<1x8x8xbf16> to vector<8x8xbf16>
    %79 = tpu.concatenate %72, %74, %76, %78 in 1 : vector<8x8xbf16>, vector<8x8xbf16>, vector<8x8xbf16>, vector<8x8xbf16> -> vector<8x32xbf16>
    %c0_17 = arith.constant 0 : index
    %c0_18 = arith.constant 0 : index
    %80 = vector.load %arg5[%c0_17, %c0_18] : memref<32x32xbf16, #tpu.memory_space<vmem>>, vector<32x32xbf16>
    %cst_19 = arith.constant dense<0.000000e+00> : vector<8x32xf32>
    %81 = tpu.matmul %79, %80, %cst_19 {dimension_numbers = #tpu.dot_dimension_numbers<[1], [0], [0], [1], [0, 0, 1, 1], [], []>} : vector<8x32xbf16>, vector<32x32xbf16>, vector<8x32xf32> -> vector<8x32xf32>
    %c0_20 = arith.constant 0 : index
    %c0_21 = arith.constant 0 : index
    %82 = vector.load %arg6[%c0_20, %c0_21] : memref<1x32xf32, #tpu.memory_space<vmem>>, vector<1x32xf32>
    %83 = vector.broadcast %82 : vector<1x32xf32> to vector<8x32xf32>
    %84 = arith.addf %81, %83 : vector<8x32xf32>
    %85 = arith.addf %1, %84 : vector<8x32xf32>
    %c0_22 = arith.constant 0 : index
    %c0_23 = arith.constant 0 : index
    %86 = vector.load %arg7[%c0_22, %c0_23] : memref<1x32xf32, #tpu.memory_space<vmem>>, vector<1x32xf32>
    %c0_24 = arith.constant 0 : index
    %c0_25 = arith.constant 0 : index
    %87 = vector.load %arg8[%c0_24, %c0_25] : memref<1x32xf32, #tpu.memory_space<vmem>>, vector<1x32xf32>
    %cst_26 = arith.constant dense<0.000000e+00> : vector<8xf32>
    %88 = vector.multi_reduction <add>, %85, %cst_26 [1] : vector<8x32xf32> to vector<8xf32>
    %89 = vector.shape_cast %88 : vector<8xf32> to vector<8x1xf32>
    %cst_27 = arith.constant 3.200000e+01 : f32
    %90 = vector.broadcast %cst_27 : f32 to vector<8x1xf32>
    %91 = arith.divf %89, %90 : vector<8x1xf32>
    %92 = vector.broadcast %91 : vector<8x1xf32> to vector<8x32xf32>
    %93 = arith.subf %85, %92 : vector<8x32xf32>
    %94 = arith.mulf %93, %93 : vector<8x32xf32>
    %cst_28 = arith.constant dense<0.000000e+00> : vector<8xf32>
    %95 = vector.multi_reduction <add>, %94, %cst_28 [1] : vector<8x32xf32> to vector<8xf32>
    %96 = vector.shape_cast %95 : vector<8xf32> to vector<8x1xf32>
    %cst_29 = arith.constant 3.200000e+01 : f32
    %97 = vector.broadcast %cst_29 : f32 to vector<8x1xf32>
    %98 = arith.divf %96, %97 : vector<8x1xf32>
    %cst_30 = arith.constant 9.99999974E-6 : f32
    %99 = vector.broadcast %cst_30 : f32 to vector<8x1xf32>
    %100 = arith.addf %98, %99 : vector<8x1xf32>
    %101 = math.rsqrt %100 : vector<8x1xf32>
    %102 = vector.broadcast %91 : vector<8x1xf32> to vector<8x32xf32>
    %103 = arith.subf %85, %102 : vector<8x32xf32>
    %104 = vector.broadcast %101 : vector<8x1xf32> to vector<8x32xf32>
    %105 = arith.mulf %103, %104 : vector<8x32xf32>
    %106 = vector.broadcast %86 : vector<1x32xf32> to vector<8x32xf32>
    %107 = arith.mulf %105, %106 : vector<8x32xf32>
    %108 = vector.broadcast %87 : vector<1x32xf32> to vector<8x32xf32>
    %109 = arith.addf %107, %108 : vector<8x32xf32>
    %110 = arith.truncf %109 : vector<8x32xf32> to vector<8x32xbf16>
    %c0_31 = arith.constant 0 : index
    %c0_32 = arith.constant 0 : index
    %111 = vector.load %arg9[%c0_31, %c0_32] : memref<32x128xbf16, #tpu.memory_space<vmem>>, vector<32x128xbf16>
    %cst_33 = arith.constant dense<0.000000e+00> : vector<8x128xf32>
    %112 = tpu.matmul %110, %111, %cst_33 {dimension_numbers = #tpu.dot_dimension_numbers<[1], [0], [0], [1], [0, 0, 1, 1], [], []>} : vector<8x32xbf16>, vector<32x128xbf16>, vector<8x128xf32> -> vector<8x128xf32>
    %c0_34 = arith.constant 0 : index
    %c0_35 = arith.constant 0 : index
    %113 = vector.load %arg10[%c0_34, %c0_35] : memref<1x128xf32, #tpu.memory_space<vmem>>, vector<1x128xf32>
    %114 = vector.broadcast %113 : vector<1x128xf32> to vector<8x128xf32>
    %115 = arith.addf %112, %114 : vector<8x128xf32>
    %cst_36 = arith.constant 5.000000e-01 : f32
    %116 = vector.broadcast %cst_36 : f32 to vector<8x128xf32>
    %117 = arith.mulf %116, %115 : vector<8x128xf32>
    %cst_37 = arith.constant 0.707106769 : f32
    %118 = vector.broadcast %cst_37 : f32 to vector<8x128xf32>
    %119 = arith.mulf %115, %118 : vector<8x128xf32>
    %120 = math.erf %119 : vector<8x128xf32>
    %cst_38 = arith.constant 1.000000e+00 : f32
    %121 = vector.broadcast %cst_38 : f32 to vector<8x128xf32>
    %122 = arith.addf %121, %120 : vector<8x128xf32>
    %123 = arith.mulf %117, %122 : vector<8x128xf32>
    %124 = arith.truncf %123 : vector<8x128xf32> to vector<8x128xbf16>
    %c0_39 = arith.constant 0 : index
    %c0_40 = arith.constant 0 : index
    %125 = vector.load %arg11[%c0_39, %c0_40] : memref<128x32xbf16, #tpu.memory_space<vmem>>, vector<128x32xbf16>
    %cst_41 = arith.constant dense<0.000000e+00> : vector<8x32xf32>
    %126 = tpu.matmul %124, %125, %cst_41 {dimension_numbers = #tpu.dot_dimension_numbers<[1], [0], [0], [1], [0, 0, 1, 1], [], []>} : vector<8x128xbf16>, vector<128x32xbf16>, vector<8x32xf32> -> vector<8x32xf32>
    %c0_42 = arith.constant 0 : index
    %c0_43 = arith.constant 0 : index
    %127 = vector.load %arg12[%c0_42, %c0_43] : memref<1x32xf32, #tpu.memory_space<vmem>>, vector<1x32xf32>
    %128 = vector.broadcast %127 : vector<1x32xf32> to vector<8x32xf32>
    %129 = arith.addf %126, %128 : vector<8x32xf32>
    %130 = arith.addf %85, %129 : vector<8x32xf32>
    %c0_44 = arith.constant 0 : index
    %c0_45 = arith.constant 0 : index
    %c0_46 = arith.constant 0 : index
    %131 = vector.load %arg13[%c0_44, %c0_45, %c0_46] : memref<1x8x32xf32, #tpu.memory_space<vmem>>, vector<1x8x32xf32>
    %132 = vector.shape_cast %131 : vector<1x8x32xf32> to vector<8x32xf32>
    %133 = vector.shape_cast %130 : vector<8x32xf32> to vector<1x8x32xf32>
    tpu.vector_store %arg13[%c0_44, %c0_45, %c0_46], %133 {strides = array<i32>} : memref<1x8x32xf32, #tpu.memory_space<vmem>>, vector<1x8x32xf32>,
    return
  }
  func.func @transform_0(%arg0: i32) -> (i32, i32, i32) {
    %c0_i32 = arith.constant 0 : i32
    %c0_i32_0 = arith.constant 0 : i32
    %c0_i32_1 = arith.constant 0 : i32
    return %arg0, %c0_i32, %c0_i32_0 : i32, i32, i32
  }
  func.func @transform_1(%arg0: i32) -> (i32, i32) {
    %c0_i32 = arith.constant 0 : i32
    %c0_i32_0 = arith.constant 0 : i32
    %c0_i32_1 = arith.constant 0 : i32
    return %c0_i32, %c0_i32_0 : i32, i32
  }
  func.func @transform_2(%arg0: i32) -> (i32, i32) {
    %c0_i32 = arith.constant 0 : i32
    %c0_i32_0 = arith.constant 0 : i32
    %c0_i32_1 = arith.constant 0 : i32
    return %c0_i32, %c0_i32_0 : i32, i32
  }
  func.func @transform_3(%arg0: i32) -> (i32, i32) {
    %c0_i32 = arith.constant 0 : i32
    %c0_i32_0 = arith.constant 0 : i32
    %c0_i32_1 = arith.constant 0 : i32
    return %c0_i32, %c0_i32_0 : i32, i32
  }
  func.func @transform_4(%arg0: i32) -> (i32, i32) {
    %c0_i32 = arith.constant 0 : i32
    %c0_i32_0 = arith.constant 0 : i32
    %c0_i32_1 = arith.constant 0 : i32
    return %c0_i32, %c0_i32_0 : i32, i32
  }
  func.func @transform_5(%arg0: i32) -> (i32, i32) {
    %c0_i32 = arith.constant 0 : i32
    %c0_i32_0 = arith.constant 0 : i32
    %c0_i32_1 = arith.constant 0 : i32
    return %c0_i32, %c0_i32_0 : i32, i32
  }
  func.func @transform_6(%arg0: i32) -> (i32, i32) {
    %c0_i32 = arith.constant 0 : i32
    %c0_i32_0 = arith.constant 0 : i32
    %c0_i32_1 = arith.constant 0 : i32
    return %c0_i32, %c0_i32_0 : i32, i32
  }
  func.func @transform_7(%arg0: i32) -> (i32, i32) {
    %c0_i32 = arith.constant 0 : i32
    %c0_i32_0 = arith.constant 0 : i32
    %c0_i32_1 = arith.constant 0 : i32
    return %c0_i32, %c0_i32_0 : i32, i32
  }
  func.func @transform_8(%arg0: i32) -> (i32, i32) {
    %c0_i32 = arith.constant 0 : i32
    %c0_i32_0 = arith.constant 0 : i32
    %c0_i32_1 = arith.constant 0 : i32
    return %c0_i32, %c0_i32_0 : i32, i32
  }
  func.func @transform_9(%arg0: i32) -> (i32, i32) {
    %c0_i32 = arith.constant 0 : i32
    %c0_i32_0 = arith.constant 0 : i32
    %c0_i32_1 = arith.constant 0 : i32
    return %c0_i32, %c0_i32_0 : i32, i32
  }
  func.func @transform_10(%arg0: i32) -> (i32, i32) {
    %c0_i32 = arith.constant 0 : i32
    %c0_i32_0 = arith.constant 0 : i32
    %c0_i32_1 = arith.constant 0 : i32
    return %c0_i32, %c0_i32_0 : i32, i32
  }
  func.func @transform_11(%arg0: i32) -> (i32, i32) {
    %c0_i32 = arith.constant 0 : i32
    %c0_i32_0 = arith.constant 0 : i32
    %c0_i32_1 = arith.constant 0 : i32
    return %c0_i32, %c0_i32_0 : i32, i32
  }
  func.func @transform_12(%arg0: i32) -> (i32, i32, i32) {
    %c0_i32 = arith.constant 0 : i32
    %c0_i32_0 = arith.constant 0 : i32
    %c0_i32_1 = arith.constant 0 : i32
    return %arg0, %c0_i32, %c0_i32_0 : i32, i32, i32
  }
}

</mosaic_0001>

<bundles_post_ra>
// kernel: tpu_custom_call.1
= control target key start
LH: loop header
LB: loop body
LE: loop exit
PB: predicated region body
PF: predicated region fallthrough
CT: control target
= control target key end

     0   :  { %s1974_s0 = inlined_call_operand.vmem [shape: f32[2,8,32], index: 0, kind: input, shape index: {}]   ;;  %s1975_s1 = inlined_call_operand.vmem [shape: f32[1,32], index: 1, kind: input, shape index: {}]   ;;  %s1976_s2 = inlined_call_operand.vmem [shape: f32[1,32], index: 2, kind: input, shape index: {}]   ;;  %s1977_s3 = inlined_call_operand.vmem [shape: bf16[32,96], index: 3, kind: input, shape index: {}]   ;;  %s1978_s4 = inlined_call_operand.vmem [shape: bf16[32,32], index: 4, kind: input, shape index: {}]   ;;  %s1979_s5 = inlined_call_operand.vmem [shape: f32[1,32], index: 5, kind: input, shape index: {}]   ;;  %s1980_s6 = inlined_call_operand.vmem [shape: f32[1,32], index: 6, kind: input, shape index: {}]   ;;  %s1981_s7 = inlined_call_operand.vmem [shape: f32[1,32], index: 7, kind: input, shape index: {}]   ;;  %s1982_s8 = inlined_call_operand.vmem [shape: bf16[32,128], index: 8, kind: input, shape index: {}]   ;;  %s1983_s9 = inlined_call_operand.vmem [shape: f32[1,128], index: 9, kind: input, shape index: {}]   ;;  %s1984_s10 = inlined_call_operand.vmem [shape: bf16[128,32], index: 10, kind: input, shape index: {}]   ;;  %s1985_s11 = inlined_call_operand.vmem [shape: f32[1,32], index: 11, kind: input, shape index: {}]   ;;  %s1986_s12 = inlined_call_operand.hbm [shape: f32[2,8,32], index: 12, kind: output, shape index: {}]  }
   0x1   :  { %1987 = sst [smem:[#allocation5_spill]] %s1974_s0 }
   0x2   :  { %1988 = sst [smem:[#allocation6_spill]] %s1975_s1 }
   0x3   :  { %17 = vsyncpa [#allocation3], 0 }
   0x4   :  { %19 = vsyncpa [#allocation3 + $0x1], 0  ;;  %s1713_s21 = smov 0   ;;  %s1715_s22 = smov 0  }
   0x5   :  { %s1717_s23 = smov 0   ;;  %s1719_s24 = smov 0  }
   0x6 LB: > { %s1734_s25 = sadd.s32 4294967295, %s1635_s24   ;;  %s1320_s26 = sadd.s32 4294967294, %s1635_s24   ;;  %s1635_s24 = sphi %s1719_s24, %s1996_s24   ;;  %s1631_s23 = sphi %s1717_s23, %s1995_s23   ;;  %s1627_s22 = sphi %s1715_s22, %s1994_s22   ;;  %s1623_s21 = sphi %s1713_s21, %s1993_s21  }
   0x7   : > { %s1738_s27 = sadd.s32 1, %s1635_s24   ;;  %s289_s28 = sadd.s32 1, %s1631_s23 }
   0x8   : > { %s286_s29 = ssub.s32 %s1635_s24, %s1738_s27  ;;  %p299_p0 = scmp.ne.s32.totalorder %s1631_s23, %s1627_s22 }
   0x9   : > { %p287_p1 = scmp.eq.s32.totalorder %s286_s29, 0  ;;  %p300_p2 = scmp.eq.s32.totalorder %s1734_s25, 1 }
   0xa   : > { %p305_p3 = scmp.ne.s32.totalorder %s1627_s22, %s1623_s21  ;;  %p306_p4 = scmp.eq.s32.totalorder %s1320_s26, 1 }
   0xb   : > { %s1749_s30 = scalar_select %p287_p1, %s1631_s23, %s289_s28  }
   0xc   : > { %p1751_p5 = por %p300_p2, %p299_p0  ;;  %p1755_p6 = por %p306_p4, %p305_p3 }
   0xd   : > { %p1323_p7 = scmp.ge.s32.totalorder %s1635_s24, 1  ;;  %p364_p8 = scmp.lt.s32.totalorder %s1635_s24, 3 }
   0xf   : > { %p365_p9 = pnand %p1323_p7, %p364_p8 }
  0x10   : > { %p405_p10 = scmp.lt.s32.totalorder (!%p365_p9), %s1734_s25, 1  ;;  %vm413_vm0 = vcmask (!%p365_p9), 261120   ;;  %s1991_s0 = sld [smem:[#allocation5_spill]] (!%p365_p9)  ;;  %v1537_v7 = vld [vmem:[%s1977_s3] sm:$0xff] (!%p365_p9)   ;;  %v1637_v8 = vmov (!%p365_p9), 0.0   ;;  %vm1638_vm1 = vmmov (!%p365_p9), 0  }
  0x11   : > { %368 = sbr.rel (%p365_p9) target bundleno = 2502 (0x9c6), region = 68  ;;  %1396 = vmatprep.subr.bf16.mxu0 (!%p365_p9), %v1637_v8  ;;  %1400 = vmatprep.mubr.msk.bf16.mxu0 (!%p365_p9), %vm1638_vm1, %v1637_v8  ;;  %v1538_v9 = vld [vmem:[%s1977_s3 + $0x8] sm:$0xff] (!%p365_p9)   ;;  %s1992_s1 = sld [smem:[#allocation6_spill]] (!%p365_p9)  ;;  %v1327_v16 = vld [vmem:[%s1976_s2] ss:$0 sm:$0xff] (!%p365_p9)  ;;  %vm512_vm2 = vcmask (!%p365_p9), 64512  }
  0x12   : > { %1397 = vmatpush3.bf16.msra.mxu0 (!%p365_p9), %v1537_v7  ;;  %1416 = vmatprep.subr.bf16.mxu1 (!%p365_p9), %v1637_v8  ;;  %s1640_s20 = smov (!%p365_p9), 120   ;;  %s1641_s26 = smov (!%p365_p9), 112   ;;  %vm748_vm3 = vcmask (!%p365_p9), 1043456   ;;  %vm960_vm4 = vcmask (!%p365_p9), 130048   ;;  %vm963_vm5 = vcmask (!%p365_p9), 195584  }
  0x13   : > { %1398 = vmatprep.subr.bf16.mxu0 (!%p365_p9), %v1637_v8  ;;  %1418 = vmatprep.mubr.msk.bf16.mxu1 (!%p365_p9), %vm1638_vm1, %v1637_v8  ;;  %s1642_s28 = smov (!%p365_p9), 96   ;;  %s1643_s29 = smov (!%p365_p9), 64  }
  0x14   : > { %s1359_s18 = sshll.u32 (!%p365_p9), %s1734_s25, 7 }
  0x16   : > { %1399 = vmatpush3.bf16.msra.mxu0 (!%p365_p9), %v1538_v9 }
  0x17   : > { %1404 = vmatprep.subr.bf16.mxu0 (!%p365_p9), %v1637_v8  ;;  %v1326_v14 = vld [vmem:[%s1992_s1] ss:$0 sm:$0xff] (!%p365_p9) }
  0x18   : > { %s406_s15 = scalar_select %p405_p10, %s1734_s25, 1 }
  0x1a   : > { %s1325_s16 = sshll.u32 %s406_s15, 3 }
  0x1b   : > { %s408_s19 = scalar_lea.vmem %s1991_s0, %s1325_s16  ;;  %s1931_s0 = scalar_lea.hbm %s1986_s12, %s1359_s18 }
  0x1c   : > { %v1766_v0 = vld [vmem:[%s408_s19] sm:$0xff]  ;;  %s1639_s19 = smov 104   ;;  %s1647_s16 = smov [#allocation2]  }
  0x1d   : > { %v414_v1 = vsel %vm413_vm0, %v1766_v0, 0.0  ;;  %s1577_s17 = sshll.u32 %s1647_s16, 4  ;;  %s1578_s17 = int_to_ptr.vmem [resolvable:$false] %s1577_s17 }
  0x1e   : > { %415 = vadd.xlane.f32.xlu0 %v414_v1  ;;  %s1579_s1 = scalar_lea.vmem %s1578_s17, 256 }
  0xab   : > { %v416_v2 = vpop.xlane.xlu0 %415 }
  0xac   : > { %v418_v3 = vmul.f32 0.03125, %v416_v2 }
  0xae   : > { %v419_v4 = vsub.f32 %v1766_v0, %v418_v3 }
  0xb0   : > { %v420_v5 = vmul.f32 %v419_v4, %v419_v4 }
  0xb2   : > { %v421_v6 = vsel %vm413_vm0, %v420_v5, 0.0 }
  0xb3   : > { %422 = vadd.xlane.f32.xlu0 %v421_v6 }
 0x140   : > { %v423_v10 = vpop.xlane.xlu0 %422 }
 0x141   : > { %v424_v11 = vmul.f32 0.03125, %v423_v10 }
 0x143   : > { %v425_v12 = vadd.f32 1e-05, %v424_v11 }
 0x145   : > { %1551 = vrsqrt.f32 %v425_v12 }
 0x14f   : > { %v1552_v13 = vpop.eup %1551 }
 0x150   : > { %v427_v15 = vmul.f32 %v1552_v13, %v419_v4 }
 0x152   : > { %v434_v17 = vmul.f32 %v1326_v14, %v427_v15 }
 0x154   : > { %v441_v18 = vadd.f32 %v1327_v16, %v434_v17 }
 0x156   : > { %v442_v19 = vpack.c.bf16 %v441_v18, %v441_v18 }
 0x158   : > { %1401 = vmatmul.mubr.msk.bf16.vlgmr.msra.gmra.mrb[0].mxu0 %vm413_vm0, %v442_v19 }
 0x159   : > { %1406 = vmatprep.mubr.msk.bf16.mxu0 %vm1638_vm1, %v1637_v8 }
 0x22b   : > { %v496_v20 = vpop.f32.mrb[0].mxu0 }
 0x22c   : > { %v502_v21 = vpack.c.bf16 %v496_v20, %v496_v20  ;;  %v1402_v22 = vpop.f32.mrb[1].mxu0 }
 0x22d   : > { %v499_v23 = vpop.f32.mrb[2].mxu0 }
 0x22e   : > { %508 = vrot.lane.b32.xlu0 %v502_v21, %s1639_s19  ;;  %504 = vrot.lane.b32.xlu1 %v502_v21, %s1640_s20  ;;  %v1403_v24 = vpop.f32.mrb[3].mxu0  ;;  %s1644_s19 = smov 8   ;;  %s1645_s20 = smov 16  }
 0x232   : > { %506 = vrot.lane.b32.xlu1 %v502_v21, %s1641_s26  ;;  %s1646_s26 = smov 24  }
 0x236   : > { %510 = vrot.lane.b32.xlu1 %v502_v21, %s1642_s28 }
 0x2a0   : > { %v1795_v25 = vpop.permute.xlu1 %504  ;;  %v509_v27 = vpop.permute.xlu0 %508 }
 0x2a1   : > { %559 = vrot.lane.b32.xlu1 %v1795_v25, %s1642_s28 }
 0x2a4   : > { %v507_v26 = vpop.permute.xlu1 %506 }
 0x2a5   : > { %607 = vrot.lane.b32.xlu1 %v507_v26, %s1642_s28 }
 0x2a8   : > { %v511_v28 = vpop.permute.xlu1 %510 }
 0x2a9   : > { %v517_v29 = vsel %vm512_vm2, %v511_v28, 0  ;;  %655 = vrot.lane.b32.xlu1 %v509_v27, %s1642_s28 }
 0x2aa   : > { %1405 = vmatpush3.bf16.xpose.msra.mxu0 %v517_v29 }
 0x2ab   : > { %1410 = vmatprep.subr.bf16.mxu0 %v1637_v8 }
 0x2ad   : > { %743 = vrot.lane.b32.xlu1 %v502_v21, %s1643_s29 }
 0x2b1   : > { %1407 = vmatmul.mubr.msk.bf16.vlgmr.msra.gmra.mrb[4].mxu0 %vm512_vm2, %v502_v21 }
 0x2b2   : > { %1412 = vmatprep.mubr.msk.bf16.mxu0 %vm1638_vm1, %v1637_v8 }
 0x313   : > { %v560_v30 = vpop.permute.xlu1 %559 }
 0x314   : > { %v565_v31 = vsel %vm512_vm2, %v560_v30, 0 }
 0x315   : > { %1411 = vmatpush3.bf16.xpose.msra.mxu0 %v565_v31 }
 0x316   : > { %1422 = vmatprep.subr.bf16.mxu0 %v1637_v8 }
 0x317   : > { %v608_v32 = vpop.permute.xlu1 %607 }
 0x318   : > { %v613_v33 = vsel %vm512_vm2, %v608_v32, 0  ;;  %v1539_v32 = vld [vmem:[%s1978_s4] sm:$0xff]  }
 0x319   : > { %1417 = vmatpush3.bf16.xpose.msra.mxu1 %v613_v33 }
 0x31a   : > { %1428 = vmatprep.subr.bf16.mxu1 %v1637_v8 }
 0x31b   : > { %v656_v34 = vpop.permute.xlu1 %655 }
 0x31c   : > { %v661_v35 = vsel %vm512_vm2, %v656_v34, 0  ;;  %1413 = vmatmul.mubr.msk.bf16.vlgmr.msra.gmra.mrb[8].mxu0 %vm512_vm2, %v1795_v25  ;;  %v1540_v34 = vld [vmem:[%s1978_s4 + $0x8] sm:$0xff]  }
 0x31d   : > { %1423 = vmatpush3.bf16.xpose.msra.mxu0 %v661_v35  ;;  %1424 = vmatprep.mubr.msk.bf16.mxu0 %vm1638_vm1, %v1637_v8 }
 0x31e   : > { %1434 = vmatprep.subr.bf16.mxu0 %v1637_v8 }
 0x31f   : > { %v744_v36 = vpop.permute.xlu1 %743 }
 0x320   : > { %v750_v37 = vsel %vm748_vm3, %v744_v36, 0  ;;  %1419 = vmatmul.mubr.msk.bf16.vlgmr.msra.gmra.mrb[0].mxu1 %vm512_vm2, %v507_v26 }
 0x321   : > { %1429 = vmatpush3.bf16.msra.mxu1 %v750_v37  ;;  %1430 = vmatprep.mubr.msk.bf16.mxu1 %vm1638_vm1, %v1637_v8 }
 0x322   : > { %1440 = vmatprep.subr.bf16.mxu1 %v1637_v8 }
 0x324   : > { %1425 = vmatmul.mubr.msk.bf16.vlgmr.msra.gmra.mrb[12].mxu0 %vm512_vm2, %v509_v27 }
 0x325   : > { %1436 = vmatprep.mubr.msk.bf16.mxu0 %vm1638_vm1, %v1637_v8 }
 0x384   : > { %v553_v38 = vpop.f32.mrb[4].mxu0 }
 0x385   : > { %v1408_v39 = vpop.f32.mrb[5].mxu0  ;;  %v703_v40 = vsel %vm512_vm2, %v553_v38, -inf }
 0x386   : > { %704 = vmax.xlane.f32.xlu1 %v703_v40  ;;  %v556_v41 = vpop.f32.mrb[6].mxu0 }
 0x387   : > { %v1409_v42 = vpop.f32.mrb[7].mxu0 }
 0x3ef   : > { %v601_v43 = vpop.f32.mrb[8].mxu0 }
 0x3f0   : > { %v1414_v44 = vpop.f32.mrb[9].mxu0  ;;  %v706_v45 = vsel %vm512_vm2, %v601_v43, -inf }
 0x3f1   : > { %707 = vmax.xlane.f32.xlu0 %v706_v45  ;;  %v604_v46 = vpop.f32.mrb[10].mxu0 }
 0x3f2   : > { %v1415_v47 = vpop.f32.mrb[11].mxu0 }
 0x3f3   : > { %v649_v48 = vpop.f32.mrb[0].mxu1 }
 0x3f4   : > { %v1420_v49 = vpop.f32.mrb[1].mxu1  ;;  %v709_v50 = vsel %vm512_vm2, %v649_v48, -inf }
 0x3f5   : > { %v652_v51 = vpop.f32.mrb[2].mxu1  ;;  %710 = vmax.xlane.f32.xlu1 %v709_v50 }
 0x3f6   : > { %v1421_v52 = vpop.f32.mrb[3].mxu1 }
 0x3f7   : > { %v697_v53 = vpop.f32.mrb[12].mxu0 }
 0x3f8   : > { %v1426_v54 = vpop.f32.mrb[13].mxu0  ;;  %v712_v55 = vsel %vm512_vm2, %v697_v53, -inf }
 0x3f9   : > { %713 = vmax.xlane.f32.xlu0 %v712_v55  ;;  %v700_v56 = vpop.f32.mrb[14].mxu0 }
 0x3fa   : > { %v1427_v57 = vpop.f32.mrb[15].mxu0 }
 0x406   : > { %840 = vrot.lane.b32.xlu1 %v507_v26, %s1643_s29 }
 0x40a   : > { %888 = vrot.lane.b32.xlu1 %v509_v27, %s1643_s29 }
 0x40f   : > { %792 = vrot.lane.b32.xlu0 %v1795_v25, %s1643_s29  ;;  %s402_s29 = sand.u32 1, %s1627_s22  }
 0x410   : > { %s1324_s15 = sshll.u32 %s402_s29, 3  ;;  %s1248_s25 = scalar_lea.sflag [#allocation3], %s402_s29 }
 0x413   : > { %v705_v58 = vpop.xlane.xlu1 %704 }
 0x414   : > { %v715_v59 = vsub.f32 %v553_v38, %v705_v58 }
 0x416   : > { %v719_v60 = vmul.f32 1.442695, %v715_v59 }
 0x418   : > { %1553 = vpow2.f32 %v719_v60 }
 0x422   : > { %v1554_v61 = vpop.eup %1553 }
 0x423   : > { %v739_v62 = vpack.c.bf16 %v1554_v61, %v1554_v61  ;;  %v727_v25 = vsel %vm512_vm2, %v1554_v61, 0.0 }
 0x425   : > { %1431 = vmatmul.mubr.msk.bf16.vlgmr.msra.gmra.mrb[4].mxu1 %vm512_vm2, %v739_v62 }
 0x426   : > { %1442 = vmatprep.mubr.msk.bf16.mxu1 %vm1638_vm1, %v1637_v8 }
 0x47e   : > { %v708_v63 = vpop.xlane.xlu0 %707 }
 0x47f   : > { %v716_v1 = vsub.f32 %v601_v43, %v708_v63 }
 0x481   : > { %v721_v2 = vmul.f32 1.442695, %v716_v1 }
 0x482   : > { %v711_v3 = vpop.xlane.xlu1 %710 }
 0x483   : > { %1555 = vpow2.f32 %v721_v2  ;;  %v717_v4 = vsub.f32 %v649_v48, %v711_v3  ;;  %v1339_v3 = vld [vmem:[%s1979_s5] ss:$0 sm:$0xff] }
 0x485   : > { %v723_v5 = vmul.f32 1.442695, %v717_v4 }
 0x486   : > { %v841_v6 = vpop.permute.xlu1 %840  ;;  %v714_v7 = vpop.xlane.xlu0 %713 }
 0x487   : > { %1557 = vpow2.f32 %v723_v5  ;;  %v846_v9 = vsel %vm748_vm3, %v841_v6, 0  ;;  %v718_v10 = vsub.f32 %v697_v53, %v714_v7 }
 0x488   : > { %1441 = vmatpush3.bf16.msra.mxu1 %v846_v9 }
 0x489   : > { %v725_v11 = vmul.f32 1.442695, %v718_v10  ;;  %1452 = vmatprep.subr.bf16.mxu1 %v1637_v8 }
 0x48a   : > { %v793_v12 = vpop.permute.xlu0 %792  ;;  %v889_v15 = vpop.permute.xlu1 %888 }
 0x48b   : > { %1559 = vpow2.f32 %v725_v11  ;;  %v798_v13 = vsel %vm748_vm3, %v793_v12, 0  ;;  %v894_v18 = vsel %vm748_vm3, %v889_v15, 0 }
 0x48c   : > { %1435 = vmatpush3.bf16.msra.mxu0 %v798_v13 }
 0x48d   : > { %v1556_v14 = vpop.eup %1555  ;;  %1446 = vmatprep.subr.bf16.mxu0 %v1637_v8 }
 0x48e   : > { %v730_v16 = vsel %vm512_vm2, %v1556_v14, 0.0  ;;  %v740_v17 = vpack.c.bf16 %v1556_v14, %v1556_v14 }
 0x48f   : > { %731 = vadd.xlane.f32.xlu0 %v730_v16 }
 0x490   : > { %1437 = vmatmul.mubr.msk.bf16.vlgmr.msra.gmra.mrb[16].mxu0 %vm512_vm2, %v740_v17  ;;  %v1541_v17 = vld [vmem:[%s1982_s8] sm:$0xff]  }
 0x491   : > { %v1558_v19 = vpop.eup %1557  ;;  %1447 = vmatpush3.bf16.msra.mxu0 %v894_v18  ;;  %1448 = vmatprep.mubr.msk.bf16.mxu0 %vm1638_vm1, %v1637_v8  ;;  %v1543_v18 = vld [vmem:[%s1984_s10] sm:$0xff]  }
 0x492   : > { %v733_v20 = vsel %vm512_vm2, %v1558_v19, 0.0  ;;  %v741_v21 = vpack.c.bf16 %v1558_v19, %v1558_v19  ;;  %1460 = vmatprep.subr.bf16.mxu0 %v1637_v8  ;;  %v1544_v19 = vld [vmem:[%s1984_s10 + $0x8] sm:$0xff]  }
 0x493   : > { %734 = vadd.xlane.f32.xlu1 %v733_v20  ;;  %v1545_v20 = vld [vmem:[%s1984_s10 + $0x10] sm:$0xff]  }
 0x494   : > { %1443 = vmatmul.mubr.msk.bf16.vlgmr.msra.gmra.mrb[8].mxu1 %vm512_vm2, %v741_v21 }
 0x495   : > { %v1560_v22 = vpop.eup %1559  ;;  %1456 = vmatprep.mubr.msk.bf16.mxu1 %vm1638_vm1, %v1637_v8  ;;  %1453 = vmatpush3.bf16.msra.mxu1 %v1539_v32  ;;  %v1547_v32 = vld [vmem:[%s1984_s10 + $0x20] sm:$0xff]  }
 0x496   : > { %v736_v23 = vsel %vm512_vm2, %v1560_v22, 0.0  ;;  %v742_v24 = vpack.c.bf16 %v1560_v22, %v1560_v22  ;;  %1454 = vmatprep.subr.bf16.mxu1 %v1637_v8 }
 0x497   : > { %737 = vadd.xlane.f32.xlu0 %v736_v23 }
 0x498   : > { %1449 = vmatmul.mubr.msk.bf16.vlgmr.msra.gmra.mrb[20].mxu0 %vm512_vm2, %v742_v24 }
 0x499   : > { %1464 = vmatprep.mubr.msk.bf16.mxu0 %vm1638_vm1, %v1637_v8  ;;  %1455 = vmatpush3.bf16.msra.mxu1 %v1540_v34  ;;  %v1549_v34 = vld [vmem:[%s1984_s10 + $0x30] sm:$0xff]  }
 0x49a   : > { %1468 = vmatprep.subr.bf16.mxu1 %v1637_v8  ;;  %1461 = vmatpush3.bf16.msra.mxu0 %v1541_v17 }
 0x49b   : > { %728 = vadd.xlane.f32.xlu0 %v727_v25  ;;  %1462 = vmatprep.subr.bf16.mxu0 %v1637_v8  ;;  %v1343_v25 = vld [vmem:[%s1980_s6] ss:$0 sm:$0xff] }
 0x4f8   : > { %v786_v26 = vpop.f32.mrb[4].mxu1 }
 0x4f9   : > { %v1432_v27 = vpop.f32.mrb[5].mxu1 }
 0x4fa   : > { %v789_v28 = vpop.f32.mrb[6].mxu1  ;;  %v1344_v27 = vld [vmem:[%s1981_s7] ss:$0 sm:$0xff] }
 0x4fb   : > { %v1433_v29 = vpop.f32.mrb[7].mxu1 }
 0x51c   : > { %v732_v30 = vpop.xlane.xlu0 %731 }
 0x51d   : > { %1561 = vrcp.f32 %v732_v30 }
 0x520   : > { %v735_v31 = vpop.xlane.xlu1 %734 }
 0x521   : > { %1563 = vrcp.f32 %v735_v31  ;;  %v1546_v31 = vld [vmem:[%s1984_s10 + $0x18] sm:$0xff]  }
 0x524   : > { %v738_v33 = vpop.xlane.xlu0 %737 }
 0x525   : > { %1565 = vrcp.f32 %v738_v33  ;;  %v1548_v33 = vld [vmem:[%s1984_s10 + $0x28] sm:$0xff]  }
 0x527   : > { %v1562_v35 = vpop.eup %1561 }
 0x528   : > { %v729_v56 = vpop.xlane.xlu0 %728 }
 0x529   : > { %1567 = vrcp.f32 %v729_v56 }
 0x52b   : > { %v1564_v42 = vpop.eup %1563 }
 0x52f   : > { %v1566_v49 = vpop.eup %1565 }
 0x533   : > { %v1568_v57 = vpop.eup %1567 }
 0x534   : > { %v940_v58 = vmul.f32 %v1568_v57, %v786_v26 }
 0x536   : > { %v944_v60 = vpack.c.bf16 %v940_v58, %v940_v58 }
 0x563   : > { %v834_v36 = vpop.f32.mrb[16].mxu0 }
 0x564   : > { %v941_v37 = vmul.f32 %v1562_v35, %v834_v36  ;;  %v1438_v38 = vpop.f32.mrb[17].mxu0  ;;  %v1550_v35 = vld [vmem:[%s1984_s10 + $0x38] sm:$0xff]   ;;  %v1345_v36 = vld [vmem:[%s1983_s9] ss:$0 sm:$0xff] }
 0x565   : > { %v837_v39 = vpop.f32.mrb[18].mxu0 }
 0x566   : > { %v945_v40 = vpack.c.bf16 %v941_v37, %v941_v37  ;;  %v1439_v41 = vpop.f32.mrb[19].mxu0 }
 0x567   : > { %v882_v43 = vpop.f32.mrb[8].mxu1 }
 0x568   : > { %v942_v44 = vmul.f32 %v1564_v42, %v882_v43  ;;  %v1444_v45 = vpop.f32.mrb[9].mxu1  ;;  %949 = vrot.lane.b32.xlu1 %v945_v40, %s1644_s19  ;;  %s404_s19 = scalar_lea.vmem [#allocation2], %s1324_s15 }
 0x569   : > { %v885_v46 = vpop.f32.mrb[10].mxu1 }
 0x56a   : > { %v946_v47 = vpack.c.bf16 %v942_v44, %v942_v44  ;;  %v1445_v48 = vpop.f32.mrb[11].mxu1 }
 0x56b   : > { %v930_v50 = vpop.f32.mrb[20].mxu0 }
 0x56c   : > { %v943_v51 = vmul.f32 %v1566_v49, %v930_v50  ;;  %952 = vrot.lane.b32.xlu0 %v946_v47, %s1645_s20  ;;  %v1450_v52 = vpop.f32.mrb[21].mxu0  ;;  %v1349_v47 = vld [vmem:[%s1985_s11] ss:$0 sm:$0xff]  ;;  %s1261_s20 = sshll.u32 %s404_s19, 4  ;;  %s1933_s20 = int_to_ptr.vmem [resolvable:$true] %s1261_s20 }
 0x56d   : > { %v933_v53 = vpop.f32.mrb[22].mxu0  ;;  %s1573_s15 = scalar_lea.vmem %s1933_s20, 128  ;;  %p1580_p0 = scmp.lt.s32.totalorder %s1933_s20, %s1578_s17 }
 0x56e   : > { %v947_v54 = vpack.c.bf16 %v943_v51, %v943_v51  ;;  %v1451_v55 = vpop.f32.mrb[23].mxu0  ;;  %p1574_p11 = scmp.ne.s32.totalorder %s1933_s20, %s1573_s15  ;;  %p1581_p1 = scmp.lt.s32.totalorder %s1579_s1, %s1573_s15 }
 0x570   : > { %955 = vrot.lane.b32.xlu1 %v947_v54, %s1646_s26  ;;  %p1575_p12 = pnand %p1574_p11, %p1751_p5  ;;  %p1582_p2 = por %p1581_p1, %p1580_p0 }
 0x572   : > { %p1576_p13 = pneg %p1575_p12 }
 0x574   : > { %p1583_p3 = pnand %p1582_p2, %p1576_p13 }
 0x5da   : > { %v950_v59 = vpop.permute.xlu1 %949 }
 0x5db   : > { %v959_v62 = vsel %vm512_vm2, %v944_v60, %v950_v59 }
 0x5de   : > { %v953_v61 = vpop.permute.xlu0 %952 }
 0x5df   : > { %v962_v63 = vsel %vm960_vm4, %v959_v62, %v953_v61 }
 0x5e2   : > { %v956_v1 = vpop.permute.xlu1 %955 }
 0x5e3   : > { %v965_v2 = vsel %vm963_vm5, %v962_v63, %v956_v1 }
 0x5e4   : > { %1457 = vmatmul.mubr.msk.bf16.vlgmr.msra.gmra.mrb[12].mxu1 %vm413_vm0, %v965_v2 }
 0x5e5   : > { %1484 = vmatprep.mubr.msk.bf16.mxu1 %vm1638_vm1, %v1637_v8  ;;  %1469 = vmatpush3.bf16.msra.mxu1 %v1543_v18 }
 0x5e6   : > { %1470 = vmatprep.subr.bf16.mxu1 %v1637_v8 }
 0x5e9   : > { %1471 = vmatpush3.bf16.msra.mxu1 %v1544_v19 }
 0x5ea   : > { %1472 = vmatprep.subr.bf16.mxu1 %v1637_v8 }
 0x5ed   : > { %1473 = vmatpush3.bf16.msra.mxu1 %v1545_v20 }
 0x5ee   : > { %1474 = vmatprep.subr.bf16.mxu1 %v1637_v8 }
 0x5f1   : > { %1475 = vmatpush3.bf16.msra.mxu1 %v1546_v31 }
 0x5f2   : > { %1476 = vmatprep.subr.bf16.mxu1 %v1637_v8 }
 0x5f5   : > { %1477 = vmatpush3.bf16.msra.mxu1 %v1547_v32 }
 0x5f6   : > { %1478 = vmatprep.subr.bf16.mxu1 %v1637_v8 }
 0x5f9   : > { %1479 = vmatpush3.bf16.msra.mxu1 %v1548_v33 }
 0x5fa   : > { %1480 = vmatprep.subr.bf16.mxu1 %v1637_v8 }
 0x5fd   : > { %1481 = vmatpush3.bf16.msra.mxu1 %v1549_v34 }
 0x5fe   : > { %1482 = vmatprep.subr.bf16.mxu1 %v1637_v8 }
 0x601   : > { %1483 = vmatpush3.bf16.msra.mxu1 %v1550_v35 }
 0x6b7   : > { %v1025_v4 = vpop.f32.mrb[12].mxu1 }
 0x6b8   : > { %v1026_v5 = vadd.f32 %v1339_v3, %v1025_v4  ;;  %v1458_v6 = vpop.f32.mrb[13].mxu1 }
 0x6b9   : > { %v1028_v7 = vpop.f32.mrb[14].mxu1 }
 0x6ba   : > { %v1868_v9 = vadd.f32 %v1026_v5, %v1766_v0  ;;  %v1459_v10 = vpop.f32.mrb[15].mxu1  ;;  %v1542_v0 = vld [vmem:[%s1982_s8 + $0x8] sm:$0xff]  }
 0x6bb   : > { %1463 = vmatpush3.bf16.msra.mxu0 %v1542_v0 }
 0x6bc   : > { %v1034_v11 = vsel %vm413_vm0, %v1868_v9, 0.0 }
 0x6bd   : > { %1035 = vadd.xlane.f32.xlu1 %v1034_v11 }
 0x74a   : > { %v1036_v12 = vpop.xlane.xlu1 %1035 }
 0x74b   : > { %v1037_v13 = vmul.f32 0.03125, %v1036_v12 }
 0x74d   : > { %v1038_v14 = vsub.f32 %v1868_v9, %v1037_v13 }
 0x74f   : > { %v1039_v15 = vmul.f32 %v1038_v14, %v1038_v14 }
 0x751   : > { %v1040_v16 = vsel %vm413_vm0, %v1039_v15, 0.0 }
 0x752   : > { %1041 = vadd.xlane.f32.xlu0 %v1040_v16 }
 0x7df   : > { %v1042_v21 = vpop.xlane.xlu0 %1041 }
 0x7e0   : > { %v1043_v22 = vmul.f32 0.03125, %v1042_v21 }
 0x7e2   : > { %v1044_v23 = vadd.f32 1e-05, %v1043_v22 }
 0x7e4   : > { %1569 = vrsqrt.f32 %v1044_v23 }
 0x7ee   : > { %v1570_v24 = vpop.eup %1569 }
 0x7ef   : > { %v1046_v26 = vmul.f32 %v1570_v24, %v1038_v14 }
 0x7f1   : > { %v1053_v28 = vmul.f32 %v1343_v25, %v1046_v26 }
 0x7f3   : > { %v1060_v29 = vadd.f32 %v1344_v27, %v1053_v28 }
 0x7f5   : > { %v1061_v30 = vpack.c.bf16 %v1060_v29, %v1060_v29 }
 0x7f7   : > { %1465 = vmatmul.mubr.msk.bf16.vlgmr.msra.gmra.mrb[24].mxu0 %vm413_vm0, %v1061_v30 }
 0x8ca   : > { %v1122_v37 = vpop.f32.mrb[24].mxu0 }
 0x8cb   : > { %v1123_v38 = vadd.f32 %v1345_v36, %v1122_v37  ;;  %v1466_v39 = vpop.f32.mrb[25].mxu0 }
 0x8cc   : > { %v1125_v40 = vpop.f32.mrb[26].mxu0 }
 0x8cd   : > { %v1129_v41 = vmul.f32 0.70710677, %v1123_v38  ;;  %v1467_v42 = vpop.f32.mrb[27].mxu0  ;;  %v1128_v8 = vmul.f32 0.5, %v1123_v38 }
 0x8cf   : > { %1571 = verf.f32 %v1129_v41 }
 0x8d9   : > { %v1572_v43 = vpop.eup %1571 }
 0x8da   : > { %v1131_v44 = vadd.f32 1.0, %v1572_v43 }
 0x8dc   : > { %v1132_v45 = vmul.f32 %v1131_v44, %v1128_v8 }
 0x8de   : > { %v1133_v46 = vpack.c.bf16 %v1132_v45, %v1132_v45 }
 0x8e0   : > { %1485 = vmatmul.mubr.bf16.vlgmr.msra.gmra.mrb[16].mxu1 %v1133_v46 }
 0x9b3   : > { %v1239_v48 = vpop.f32.mrb[16].mxu1 }
 0x9b4   : > { %v1240_v49 = vadd.f32 %v1349_v47, %v1239_v48  ;;  %v1486_v50 = vpop.f32.mrb[17].mxu1 }
 0x9b5   : > { %v1242_v51 = vpop.f32.mrb[18].mxu1 }
 0x9b6   : > { %v1245_v52 = vadd.f32 %v1240_v49, %v1868_v9  ;;  %v1487_v53 = vpop.f32.mrb[19].mxu1 }
 0x9b8   : > { %1246 = vst.msk [vmem:[%s404_s19] sm:$0xff] %vm413_vm0, %v1245_v52 }
 0x9b9   : > { %1586 = shalt.err (!%p1583_p3)
}
 0x9ba   : > { %s1587_s29 = scalar_lea.hbm %s1931_s0, 128  ;;  %s1591_s26 = scalar_lea.hbm %s1986_s12, 256 }
 0x9bb   : > { %p1588_p4 = scmp.ne.s32.totalorder %s1931_s0, %s1587_s29  ;;  %p1592_p9 = scmp.lt.u32.totalorder %s1931_s0, %s1986_s12 }
 0x9bc   : > { %p1593_p10 = scmp.lt.u32.totalorder %s1591_s26, %s1587_s29  ;;  %p1595_p12 = scmp.lt.u32.totalorder %s1587_s29, %s1931_s0 }
 0x9bd   : > { %p1589_p7 = pnand %p1588_p4, %p1751_p5 }
 0x9be   : > { %p1594_p11 = por %p1593_p10, %p1592_p9 }
 0x9bf   : > { %p1590_p8 = pneg %p1589_p7 }
 0x9c0   : > { %p1596_p13 = por %p1595_p12, %p1594_p11 }
 0x9c2   : > { %p1597_p0 = pnand %p1596_p13, %p1590_p8 }
 0x9c4   : > { %1600 = shalt.err (!%p1597_p0)
}
 0x9c5   : > { %1488 = dma.vmem_to_hbm [thread:$0]  (%p1751_p5), %s1933_s20, 128, %s1931_s0, %s1248_s25  }
 0x9c6 PF: > { %p1494_p1 = scmp.ge.s32.totalorder %s1635_s24, 2  ;;  %s1273_s1 = sand.u32 1, %s1623_s21  }
 0x9c7   : > { %s1274_s15 = scalar_lea.sflag [#allocation3], %s1273_s1 }
 0x9c8   : > { %p1491_p2 = pnand %p1494_p1, %p1755_p6 }
 0x9ca   : > { %1618 = dma.done.wait (!%p1491_p2), %s1274_s15, 128  }
 0x9cb   : > { %1620 = vsyncadd (!%p1491_p2), %s1274_s15, 4294967168  ;;  %p22_p3 = scmp.ge.s32.totalorder %s1738_s27, 4   ;;  %s1993_s21 = smov %s1627_s22 }
 0x9cc   : > { %s1994_s22 = smov %s1631_s23  ;;  %s1995_s23 = smov %s1749_s30 }
 0x9cd   : > { %s1996_s24 = smov %s1738_s27  ;;  %24 = sbr.rel (!%p22_p3) target bundleno = 6 (0x6), region = 103 }
 0x9d4   :  { %1279 = vsyncpa [#allocation3], 1 }
 0x9d5   :  { %1281 = vsyncpa [#allocation3 + $0x1], 1 }

</bundles_post_ra>
